<compile_context>
chip_gen: v5e
topology: v5e:2x2
jax: 0.10.0
libtpu: 0.0.40
codegen_flags: <defaults>
</compile_context>

<pallas_src>
import functools
import math

import jax
import jax.numpy as jnp
from jax.experimental import pallas as pl
from jax.experimental.pallas import tpu as pltpu

_LANES = 128
# (2048, 128) f32 tile = 1 MiB; 3 inputs x 2 pipeline buffers = 6 MiB VMEM.
_MAX_BLOCK_ROWS = 2048


def _bce_kernel(x_ref, y_ref, v_ref, acc_ref, *, n_valid, block_rows, needs_mask):
    """One grid step over a (block_rows, 128) tile.

    Folded BCE-with-ignore contribution per element:
        max(x, 0) - x * 1[y >= 0.5] + log(1 + exp(-|x|))
    optionally masked by 1[void <= 0.5], accumulated into a resident
    (1, 128) lane-wise partial-sum output.
    """
    i = pl.program_id(0)

    @pl.when(i == 0)
    def _():
        acc_ref[...] = jnp.zeros_like(acc_ref)

    x = x_ref[...].astype(jnp.float32)
    y = y_ref[...].astype(jnp.float32)
    labels = (y >= 0.5).astype(jnp.float32)

    contrib = (jnp.maximum(x, 0.0) - x * labels
               + jnp.log(1.0 + jnp.exp(-jnp.abs(x))))

    if v_ref is not None:
        v = v_ref[...].astype(jnp.float32)
        contrib = jnp.where(v <= 0.5, contrib, 0.0)

    if needs_mask:
        # Kill lane-padding and out-of-bounds rows of the (partial) last tile.
        row = jax.lax.broadcasted_iota(jnp.int32, contrib.shape, 0)
        lane = jax.lax.broadcasted_iota(jnp.int32, contrib.shape, 1)
        elem = (i * block_rows + row) * _LANES + lane
        contrib = jnp.where(elem < n_valid, contrib, 0.0)

    # Sublane-only reduce per step; cross-lane reduce happens once, outside.
    acc_ref[...] += jnp.sum(contrib, axis=0, keepdims=True)


def _to_lane_rows(a, n, rows):
    """Flatten to (rows, 128). Pads only when n % 128 != 0 (<=127 elements)."""
    flat = a.reshape(-1)
    pad = rows * _LANES - n
    if pad:
        flat = jnp.pad(flat, (0, pad))
    return flat.reshape(rows, _LANES)


@functools.partial(jax.jit, static_argnames=("size_average", "batch_average"))
def binary_cross_entropy_loss(output, label, void_pixels=None,
                              size_average=True, batch_average=True):
    assert output.shape == label.shape
    shape = label.shape
    n = math.prod(shape)                      # static Python int at trace time

    rows = pl.cdiv(n, _LANES)
    block_rows = min(_MAX_BLOCK_ROWS, rows)
    num_blocks = pl.cdiv(rows, block_rows)
    needs_mask = (num_blocks * block_rows * _LANES) != n

    x2d = _to_lane_rows(output, n, rows)
    y2d = _to_lane_rows(label, n, rows)

    blk_spec = pl.BlockSpec((block_rows, _LANES), lambda i: (i, 0))
    acc_spec = pl.BlockSpec((1, _LANES), lambda i: (0, 0))

    static = dict(n_valid=n, block_rows=block_rows, needs_mask=needs_mask)

    if void_pixels is not None:
        assert void_pixels.shape == shape
        v2d = _to_lane_rows(void_pixels, n, rows)
        kernel = functools.partial(_bce_kernel, **static)
        in_specs = [blk_spec, blk_spec, blk_spec]
        args = (x2d, y2d, v2d)
    else:
        def kernel(x_ref, y_ref, acc_ref):
            _bce_kernel(x_ref, y_ref, None, acc_ref, **static)
        in_specs = [blk_spec, blk_spec]
        args = (x2d, y2d)

    lane_sums = pl.pallas_call(
        kernel,
        out_shape=jax.ShapeDtypeStruct((1, _LANES), jnp.float32),
        grid_spec=pltpu.PrefetchScalarGridSpec(
            num_scalar_prefetch=0,
            grid=(num_blocks,),
            in_specs=in_specs,
            out_specs=acc_spec,
        ),
        compiler_params=pltpu.CompilerParams(
            dimension_semantics=("arbitrary",),
        ),
    )(*args)

    final_loss = jnp.sum(lane_sums)
    if size_average:
        final_loss = final_loss / float(n)
    elif batch_average:
        final_loss = final_loss / float(shape[0])
    return final_loss


def _reference(output, label, void_pixels=None, size_average=True,
               batch_average=True):
    """Pure-JAX reference matching the PyTorch forward exactly."""
    output = output.astype(jnp.float32)
    label = label.astype(jnp.float32)
    labels = (label >= 0.5).astype(jnp.float32)
    ogz = (output >= 0.0).astype(jnp.float32)
    loss_val = output * (labels - ogz) - jnp.log(
        1.0 + jnp.exp(output - 2.0 * output * ogz))
    loss_pos_pix = -labels * loss_val
    loss_neg_pix = -(1.0 - labels) * loss_val
    if void_pixels is not None:
        w_void = (void_pixels.astype(jnp.float32) <= 0.5).astype(jnp.float32)
        loss_pos_pix = w_void * loss_pos_pix
        loss_neg_pix = w_void * loss_neg_pix
    final = jnp.sum(loss_pos_pix) + jnp.sum(loss_neg_pix)
    if size_average:
        final = final / float(output.size)
    elif batch_average:
        final = final / float(output.shape[0])
    return final


def _check(shape, key, with_void):
    k1, k2, k3 = jax.random.split(key, 3)
    output = jax.random.normal(k1, shape, jnp.float32) * 3.0
    label = (jax.random.uniform(k2, shape) > 0.5).astype(jnp.float32)
    void = ((jax.random.uniform(k3, shape) > 0.8).astype(jnp.float32)
            if with_void else None)
    got = jax.block_until_ready(binary_cross_entropy_loss(output, label, void))
    ref = _reference(output, label, void)
    assert jnp.allclose(got, ref, rtol=1e-5, atol=1e-5), (shape, with_void, got, ref)


if __name__ == "__main__":
    key = jax.random.PRNGKey(0)
    keys = jax.random.split(key, 4)

    # Primary small case (NCHW, as in PyTorch): exact 128-multiple, single tile.
    _check((2, 4, 16, 16), keys[0], with_void=True)
    _check((2, 4, 16, 16), keys[1], with_void=False)

    # Ragged case: numel not a multiple of 128 -> lane-pad + in-kernel mask.
    _check((1, 3, 7, 5), keys[2], with_void=True)

    # Multi-tile case with partial last tile: exercises accumulator init /
    # accumulation across grid steps and the out-of-bounds row mask.
    _check((3, 1, 300, 301), keys[3], with_void=True)

    print("KERNEL_OK")
</pallas_src>

<mosaic_0001>
module attributes {stable_mosaic.version = 11 : i64} {
  func.func @_bce_kernel(%arg0: i32, %arg1: memref<16x128xf32, #tpu.memory_space<vmem>>, %arg2: memref<16x128xf32, #tpu.memory_space<vmem>>, %arg3: memref<16x128xf32, #tpu.memory_space<vmem>>, %arg4: memref<1x128xf32, #tpu.memory_space<vmem>>) attributes {dimension_semantics = [#tpu.dimension_semantics<arbitrary>], iteration_bounds = array<i64: 1>, scalar_prefetch = 0 : i64, scratch_operands = 0 : i64, tpu.core_type = #tpu.core_type<tc>, window_params = [{transform_indices = @transform_0, window_bounds = array<i64: 16, 128>}, {transform_indices = @transform_1, window_bounds = array<i64: 16, 128>}, {transform_indices = @transform_2, window_bounds = array<i64: 16, 128>}, {pipeline_mode = #tpu.pipeline_mode<synchronous>, transform_indices = @transform_3, window_bounds = array<i64: 1, 128>}]} {
    %c0_i32 = arith.constant 0 : i32
    %0 = arith.cmpi eq, %arg0, %c0_i32 : i32
    %1 = arith.extui %0 : i1 to i32
    %c0_i32_0 = arith.constant 0 : i32
    %2 = arith.cmpi ne, %1, %c0_i32_0 : i32
    scf.if %2 {
      %cst_16 = arith.constant 0.000000e+00 : f32
      %31 = vector.broadcast %cst_16 : f32 to vector<1x128xf32>
      %c0_17 = arith.constant 0 : index
      %c0_18 = arith.constant 0 : index
      %32 = vector.load %arg4[%c0_17, %c0_18] : memref<1x128xf32, #tpu.memory_space<vmem>>, vector<1x128xf32>
      tpu.vector_store %arg4[%c0_17, %c0_18], %31 {strides = array<i32>} : memref<1x128xf32, #tpu.memory_space<vmem>>, vector<1x128xf32>,
    } else {
    }
    %c0 = arith.constant 0 : index
    %c0_1 = arith.constant 0 : index
    %3 = vector.load %arg1[%c0, %c0_1] : memref<16x128xf32, #tpu.memory_space<vmem>>, vector<16x128xf32>
    %c0_2 = arith.constant 0 : index
    %c0_3 = arith.constant 0 : index
    %4 = vector.load %arg2[%c0_2, %c0_3] : memref<16x128xf32, #tpu.memory_space<vmem>>, vector<16x128xf32>
    %cst = arith.constant 5.000000e-01 : f32
    %5 = vector.broadcast %cst : f32 to vector<16x128xf32>
    %6 = arith.cmpf oge, %4, %5 : vector<16x128xf32>
    %7 = arith.extui %6 : vector<16x128xi1> to vector<16x128xi32>
    %8 = arith.sitofp %7 : vector<16x128xi32> to vector<16x128xf32>
    %cst_4 = arith.constant 0.000000e+00 : f32
    %9 = vector.broadcast %cst_4 : f32 to vector<16x128xf32>
    %10 = arith.maximumf %3, %9 : vector<16x128xf32>
    %11 = arith.mulf %3, %8 : vector<16x128xf32>
    %12 = arith.subf %10, %11 : vector<16x128xf32>
    %13 = math.absf %3 : vector<16x128xf32>
    %cst_5 = arith.constant 0.000000e+00 : f32
    %14 = vector.broadcast %cst_5 : f32 to vector<16x128xf32>
    %15 = arith.subf %14, %13 : vector<16x128xf32>
    %16 = math.exp %15 : vector<16x128xf32>
    %cst_6 = arith.constant 1.000000e+00 : f32
    %17 = vector.broadcast %cst_6 : f32 to vector<16x128xf32>
    %18 = arith.addf %17, %16 : vector<16x128xf32>
    %19 = math.log %18 : vector<16x128xf32>
    %20 = arith.addf %12, %19 : vector<16x128xf32>
    %c0_7 = arith.constant 0 : index
    %c0_8 = arith.constant 0 : index
    %21 = vector.load %arg3[%c0_7, %c0_8] : memref<16x128xf32, #tpu.memory_space<vmem>>, vector<16x128xf32>
    %cst_9 = arith.constant 5.000000e-01 : f32
    %22 = vector.broadcast %cst_9 : f32 to vector<16x128xf32>
    %23 = arith.cmpf ole, %21, %22 : vector<16x128xf32>
    %cst_10 = arith.constant 0.000000e+00 : f32
    %24 = vector.broadcast %cst_10 : f32 to vector<16x128xf32>
    %25 = arith.select %23, %20, %24 : vector<16x128xi1>, vector<16x128xf32>
    %c0_11 = arith.constant 0 : index
    %c0_12 = arith.constant 0 : index
    %26 = vector.load %arg4[%c0_11, %c0_12] : memref<1x128xf32, #tpu.memory_space<vmem>>, vector<1x128xf32>
    %cst_13 = arith.constant dense<0.000000e+00> : vector<128xf32>
    %27 = vector.multi_reduction <add>, %25, %cst_13 [0] : vector<16x128xf32> to vector<128xf32>
    %28 = vector.shape_cast %27 : vector<128xf32> to vector<1x128xf32>
    %29 = arith.addf %26, %28 : vector<1x128xf32>
    %c0_14 = arith.constant 0 : index
    %c0_15 = arith.constant 0 : index
    %30 = vector.load %arg4[%c0_14, %c0_15] : memref<1x128xf32, #tpu.memory_space<vmem>>, vector<1x128xf32>
    tpu.vector_store %arg4[%c0_14, %c0_15], %29 {strides = array<i32>} : memref<1x128xf32, #tpu.memory_space<vmem>>, vector<1x128xf32>,
    return
  }
  func.func @transform_0(%arg0: i32) -> (i32, i32) {
    %c0_i32 = arith.constant 0 : i32
    %c0_i32_0 = arith.constant 0 : i32
    return %arg0, %c0_i32 : i32, i32
  }
  func.func @transform_1(%arg0: i32) -> (i32, i32) {
    %c0_i32 = arith.constant 0 : i32
    %c0_i32_0 = arith.constant 0 : i32
    return %arg0, %c0_i32 : i32, i32
  }
  func.func @transform_2(%arg0: i32) -> (i32, i32) {
    %c0_i32 = arith.constant 0 : i32
    %c0_i32_0 = arith.constant 0 : i32
    return %arg0, %c0_i32 : i32, i32
  }
  func.func @transform_3(%arg0: i32) -> (i32, i32) {
    %c0_i32 = arith.constant 0 : i32
    %c0_i32_0 = arith.constant 0 : i32
    %c0_i32_1 = arith.constant 0 : i32
    return %c0_i32, %c0_i32_0 : i32, i32
  }
}

</mosaic_0001>

<bundles_post_ra>
// kernel: binary_cross_entropy_loss.1
= control target key start
LH: loop header
LB: loop body
LE: loop exit
PB: predicated region body
PF: predicated region fallthrough
CT: control target
= control target key end

     0   :  { %v82_v0 = vmov 0.0   ;;  %s130_s0 = inlined_call_operand.vmem [shape: f32[16,128], index: 0, kind: input, shape index: {}]   ;;  %s131_s3 = inlined_call_operand.vmem [shape: f32[1,128], index: 3, kind: output, shape index: {}]   ;;  %s132_s1 = inlined_call_operand.vmem [shape: f32[16,128], index: 1, kind: input, shape index: {}]   ;;  %s133_s2 = inlined_call_operand.vmem [shape: f32[16,128], index: 2, kind: input, shape index: {}]  }
   0x1   :  { %18 = vst [vmem:[%s131_s3] sm:$0x1] %v82_v0  ;;  %v19_v1 = vld [vmem:[%s130_s0] sm:$0xff]  ;;  %v20_v2 = vld [vmem:[%s130_s0 + $0x8] sm:$0xff] }
   0x2   :  { %v35_v3 = vand.u32 2147483647, %v19_v1  ;;  %v36_v4 = vand.u32 2147483647, %v20_v2  ;;  %v21_v9 = vld [vmem:[%s132_s1] sm:$0xff]  ;;  %v22_v10 = vld [vmem:[%s132_s1 + $0x8] sm:$0xff] }
   0x3   :  { %vm23_vm0 = vcmp.ge.f32.partialorder %v21_v9, 0.5  ;;  %vm24_vm1 = vcmp.ge.f32.partialorder %v22_v10, 0.5  ;;  %v29_v17 = vmax.f32 %v19_v1, 0.0  ;;  %v30_v19 = vmax.f32 %v20_v2, 0.0  ;;  %v51_v22 = vld [vmem:[%s133_s2] sm:$0xff]  ;;  %v52_v25 = vld [vmem:[%s133_s2 + $0x8] sm:$0xff] }
   0x4   :  { %v37_v5 = vsub.f32 0.0, %v35_v3  ;;  %v38_v6 = vsub.f32 0.0, %v36_v4  ;;  %v71_v13 = vsel %vm23_vm0, 1.0, %v82_v0  ;;  %v72_v15 = vsel %vm24_vm1, 1.0, %v82_v0 }
   0x5   :  { %v31_v18 = vmul.f32 %v71_v13, %v19_v1  ;;  %v32_v20 = vmul.f32 %v72_v15, %v20_v2  ;;  %vm53_vm2 = vcmp.le.f32.partialorder %v51_v22, 0.5  ;;  %vm54_vm3 = vcmp.le.f32.partialorder %v52_v25, 0.5 }
   0x6   :  { %v39_v7 = vmul.f32 1.442695, %v37_v5  ;;  %v41_v8 = vmul.f32 1.442695, %v38_v6 }
   0x7   :  { %v33_v21 = vsub.f32 %v29_v17, %v31_v18  ;;  %v34_v24 = vsub.f32 %v30_v19, %v32_v20 }
   0x8   :  { %74 = vpow2.f32 %v39_v7  ;;  %v57_v39 = vld [vmem:[%s131_s3] sm:$0x1] }
   0x9   :  { %76 = vpow2.f32 %v41_v8 }
   0xe   :  { %v75_v11 = vpop.eup %74 }
   0xf   :  { %v77_v12 = vpop.eup %76  ;;  %v43_v14 = vadd.f32 1.0, %v75_v11 }
  0x10   :  { %v44_v16 = vadd.f32 1.0, %v77_v12 }
  0x11   :  { %78 = vlog2.f32 %v43_v14 }
  0x12   :  { %80 = vlog2.f32 %v44_v16 }
  0x17   :  { %v79_v23 = vpop.eup %78 }
  0x18   :  { %v81_v26 = vpop.eup %80  ;;  %v46_v27 = vmul.f32 0.6931472, %v79_v23 }
  0x19   :  { %v48_v28 = vmul.f32 0.6931472, %v81_v26 }
  0x1a   :  { %v49_v29 = vadd.f32 %v46_v27, %v33_v21 }
  0x1b   :  { %v50_v30 = vadd.f32 %v48_v28, %v34_v24 }
  0x1c   :  { %v55_v31 = vsel %vm53_vm2, %v49_v29, 0.0 }
  0x1d   :  { %v56_v32 = vsel %vm54_vm3, %v50_v30, 0.0 }
  0x1e   :  { %v58_v33 = vadd.f32 %v56_v32, %v55_v31 }
  0x20   :  { %v59_v34 = vrot.slane %v58_v33, 4 }
  0x22   :  { %v60_v35 = vadd.f32 %v59_v34, %v58_v33 }
  0x24   :  { %v61_v36 = vrot.slane %v60_v35, 2 }
  0x26   :  { %v62_v37 = vadd.f32 %v61_v36, %v60_v35 }
  0x28   :  { %v63_v38 = vrot.slane %v62_v37, 1 }
  0x2a   :  { %v64_v40 = vadd.f32 %v63_v38, %v62_v37 }
  0x2c   :  { %v65_v41 = vadd.f32 %v64_v40, %v57_v39 }
  0x2e   :  { %66 = vst [vmem:[%s131_s3] sm:$0x1] %v65_v41 }

</bundles_post_ra>
